<compile_context>
chip_gen: v5e
topology: v5e:2x2
jax: 0.10.0
libtpu: 0.0.40
codegen_flags: <defaults>
</compile_context>

<pallas_src>
import jax
import jax.numpy as jnp
from jax.experimental import pallas as pl
from jax.experimental.pallas import tpu as pltpu

C_IN = 32    # channels of x1 (condition)
C_OUT = 64   # channels of x0 / output


def _round_up(x, m):
    return ((x + m - 1) // m) * m


def _sft_kernel(x0_ref, x1_ref, w0_ref, b0_ref, w1_ref, b1_ref, out_ref):
    x1 = x1_ref[0]                            # (32, t_px) f32
    x0 = x0_ref[0]                            # (64, t_px) f32

    # Fused first layer for both branches: (64,32) @ (32,t) -> (64,t)
    h = jnp.dot(w0_ref[...], x1.astype(jnp.bfloat16),
                preferred_element_type=jnp.float32) + b0_ref[...]
    h = jnp.maximum(h, 0.01 * h)              # leaky_relu(0.01), single VALU max

    # Fused second layer (block-diagonal): (128,64) @ (64,t) -> (128,t)
    st = jnp.dot(w1_ref[...], h.astype(jnp.bfloat16),
                 preferred_element_type=jnp.float32) + b1_ref[...]

    scale = st[:C_OUT, :]                     # (64, t_px)
    shift = st[C_OUT:, :]                     # (64, t_px)
    out_ref[0] = (x0 * scale + shift).astype(out_ref.dtype)


def sft_layer(x0, x1, params, *, t_px=8192, out_dtype=None):
    """x0: (N, 64, H, W), x1: (N, 32, H, W) float32 (NCHW, like PyTorch).

    params are in PyTorch layout:
      ws0,wt0: (32,32)  bs0,bt0: (32,)
      ws1,wt1: (64,32)  bs1,bt1: (64,)
    """
    N, _, H, W = x0.shape
    HW = H * W
    out_dtype = x0.dtype if out_dtype is None else out_dtype

    # Free views: NCHW -> (N, C, H*W). Channels on sublanes, pixels on lanes.
    x0_3d = x0.reshape(N, C_OUT, HW)
    x1_3d = x1.reshape(N, C_IN, HW)

    # Lane-aligned pixel tile, clamped to the image size.  No host padding —
    # the ragged last tile is handled by Pallas (masked stores); OOB columns
    # are per-pixel independent so they cannot contaminate valid columns.
    t_px = min(t_px, _round_up(HW, 128))
    if N == 1:
        # Guarantee >= 2 grid steps so v7x megacore can shard across both TCs.
        t_px = min(t_px, _round_up(pl.cdiv(HW, 2), 128))
    t_px = max(t_px, 128)

    (ws0, bs0, ws1, bs1, wt0, bt0, wt1, bt1) = params

    # Pack both branches into two weight matrices (done once, tiny arrays).
    #   layer0: rows 0..31 -> scale branch, rows 32..63 -> shift branch
    w0 = jnp.concatenate([ws0, wt0], axis=0).astype(jnp.bfloat16)          # (64, 32)
    b0 = jnp.concatenate([bs0, bt0], axis=0)[:, None].astype(jnp.float32)  # (64, 1)
    #   layer1: block-diagonal so scale only sees h[:32], shift only h[32:]
    w1 = jnp.zeros((2 * C_OUT, 2 * C_IN), jnp.float32)
    w1 = w1.at[:C_OUT, :C_IN].set(ws1).at[C_OUT:, C_IN:].set(wt1)
    w1 = w1.astype(jnp.bfloat16)                                           # (128, 64)
    b1 = jnp.concatenate([bs1, bt1], axis=0)[:, None].astype(jnp.float32)  # (128, 1)

    grid = (N, pl.cdiv(HW, t_px))

    def px_spec(c):
        return pl.BlockSpec((1, c, t_px), lambda n, p: (n, 0, p))

    def full_spec(shape):
        # Constant index_map -> fetched once, VMEM-resident across grid steps.
        return pl.BlockSpec(shape, lambda n, p: (0, 0))

    out_3d = pl.pallas_call(
        _sft_kernel,
        out_shape=jax.ShapeDtypeStruct((N, C_OUT, HW), out_dtype),
        grid_spec=pltpu.PrefetchScalarGridSpec(
            num_scalar_prefetch=0,
            grid=grid,
            in_specs=[
                px_spec(C_OUT),                       # x0 tile (1, 64, t_px)
                px_spec(C_IN),                        # x1 tile (1, 32, t_px)
                full_spec((2 * C_IN, C_IN)),          # w0 (64, 32)
                full_spec((2 * C_IN, 1)),             # b0 (64, 1)
                full_spec((2 * C_OUT, 2 * C_IN)),     # w1 (128, 64)
                full_spec((2 * C_OUT, 1)),            # b1 (128, 1)
            ],
            out_specs=px_spec(C_OUT),                 # out tile (1, 64, t_px)
        ),
        compiler_params=pltpu.CompilerParams(
            dimension_semantics=("parallel", "parallel"),
            # ~17-18 MiB working set at t_px=8192; raise scoped VMEM so v5e's
            # 16 MiB default is not the limiter while staying well under v7x's
            # 64 MiB physical VMEM.
            vmem_limit_bytes=48 * 1024 * 1024,
        ),
    )(x0_3d, x1_3d, w0, b0, w1, b1)

    return out_3d.reshape(N, C_OUT, H, W)


def init_params(key):
    """Deterministic weights in PyTorch Conv2d layout: W (Cout, Cin), b (Cout,)."""
    ks = jax.random.split(key, 8)
    s = 0.1
    ws0 = jax.random.normal(ks[0], (C_IN, C_IN), jnp.float32) * s
    bs0 = jax.random.normal(ks[1], (C_IN,), jnp.float32) * s
    ws1 = jax.random.normal(ks[2], (C_OUT, C_IN), jnp.float32) * s
    bs1 = jax.random.normal(ks[3], (C_OUT,), jnp.float32) * s
    wt0 = jax.random.normal(ks[4], (C_IN, C_IN), jnp.float32) * s
    bt0 = jax.random.normal(ks[5], (C_IN,), jnp.float32) * s
    wt1 = jax.random.normal(ks[6], (C_OUT, C_IN), jnp.float32) * s
    bt1 = jax.random.normal(ks[7], (C_OUT,), jnp.float32) * s
    return (ws0, bs0, ws1, bs1, wt0, bt0, wt1, bt1)


def reference(x0, x1, params):
    """Pure-JAX f32 reference of the PyTorch forward (NCHW)."""
    (ws0, bs0, ws1, bs1, wt0, bt0, wt1, bt1) = params

    def conv1x1(x, w, b):
        return jnp.einsum('oi,nihw->nohw', w, x) + b[None, :, None, None]

    def lrelu(v):
        return jnp.where(v > 0, v, 0.01 * v)

    scale = conv1x1(lrelu(conv1x1(x1, ws0, bs0)), ws1, bs1)
    shift = conv1x1(lrelu(conv1x1(x1, wt0, bt0)), wt1, bt1)
    return x0 * scale + shift


if __name__ == "__main__":
    key = jax.random.PRNGKey(0)
    k0, k1, kp, k2, k3 = jax.random.split(key, 5)
    params = init_params(kp)

    # Case 1: small, lane-divisible shape (N=2, 16x16).
    N, H, W = 2, 16, 16
    x0 = jax.random.normal(k0, (N, C_OUT, H, W), jnp.float32)   # main feature
    x1 = jax.random.normal(k1, (N, C_IN, H, W), jnp.float32)    # condition
    out = sft_layer(x0, x1, params)
    jax.block_until_ready(out)
    ref = reference(x0, x1, params)
    assert out.shape == (N, C_OUT, H, W)
    # bf16 MXU operands with f32 accumulation -> slightly looser tolerance.
    assert jnp.allclose(out, ref, atol=3e-2, rtol=3e-2), "mismatch vs reference (case 1)"

    # Case 2: ragged pixel count + N=1 megacore clamp (H*W=169 not mult of 128).
    Nb, Hb, Wb = 1, 13, 13
    x0b = jax.random.normal(k2, (Nb, C_OUT, Hb, Wb), jnp.float32)
    x1b = jax.random.normal(k3, (Nb, C_IN, Hb, Wb), jnp.float32)
    outb = sft_layer(x0b, x1b, params)
    jax.block_until_ready(outb)
    refb = reference(x0b, x1b, params)
    assert outb.shape == (Nb, C_OUT, Hb, Wb)
    assert jnp.allclose(outb, refb, atol=3e-2, rtol=3e-2), "mismatch vs reference (case 2)"

    print("KERNEL_OK")
</pallas_src>

<mosaic_0001>
module attributes {stable_mosaic.version = 11 : i64} {
  func.func @_sft_kernel(%arg0: i32, %arg1: i32, %arg2: memref<1x64x256xf32, #tpu.memory_space<vmem>>, %arg3: memref<1x32x256xf32, #tpu.memory_space<vmem>>, %arg4: memref<64x32xbf16, #tpu.memory_space<vmem>>, %arg5: memref<64x1xf32, #tpu.memory_space<vmem>>, %arg6: memref<128x64xbf16, #tpu.memory_space<vmem>>, %arg7: memref<128x1xf32, #tpu.memory_space<vmem>>, %arg8: memref<1x64x256xf32, #tpu.memory_space<vmem>>) attributes {dimension_semantics = [#tpu.dimension_semantics<parallel>, #tpu.dimension_semantics<parallel>], iteration_bounds = array<i64: 2, 1>, scalar_prefetch = 0 : i64, scratch_operands = 0 : i64, tpu.core_type = #tpu.core_type<tc>, window_params = [{transform_indices = @transform_0, window_bounds = array<i64: 1, 64, 256>}, {transform_indices = @transform_1, window_bounds = array<i64: 1, 32, 256>}, {pipeline_mode = #tpu.pipeline_mode<synchronous>, transform_indices = @transform_2, window_bounds = array<i64: 64, 32>}, {pipeline_mode = #tpu.pipeline_mode<synchronous>, transform_indices = @transform_3, window_bounds = array<i64: 64, 1>}, {pipeline_mode = #tpu.pipeline_mode<synchronous>, transform_indices = @transform_4, window_bounds = array<i64: 128, 64>}, {pipeline_mode = #tpu.pipeline_mode<synchronous>, transform_indices = @transform_5, window_bounds = array<i64: 128, 1>}, {transform_indices = @transform_6, window_bounds = array<i64: 1, 64, 256>}]} {
    %c0 = arith.constant 0 : index
    %c0_0 = arith.constant 0 : index
    %c0_1 = arith.constant 0 : index
    %0 = vector.load %arg3[%c0, %c0_0, %c0_1] : memref<1x32x256xf32, #tpu.memory_space<vmem>>, vector<1x32x256xf32>
    %1 = vector.shape_cast %0 : vector<1x32x256xf32> to vector<32x256xf32>
    %c0_2 = arith.constant 0 : index
    %c0_3 = arith.constant 0 : index
    %c0_4 = arith.constant 0 : index
    %2 = vector.load %arg2[%c0_2, %c0_3, %c0_4] : memref<1x64x256xf32, #tpu.memory_space<vmem>>, vector<1x64x256xf32>
    %3 = vector.shape_cast %2 : vector<1x64x256xf32> to vector<64x256xf32>
    %c0_5 = arith.constant 0 : index
    %c0_6 = arith.constant 0 : index
    %4 = vector.load %arg4[%c0_5, %c0_6] : memref<64x32xbf16, #tpu.memory_space<vmem>>, vector<64x32xbf16>
    %5 = arith.truncf %1 : vector<32x256xf32> to vector<32x256xbf16>
    %cst = arith.constant dense<0.000000e+00> : vector<64x256xf32>
    %6 = tpu.matmul %4, %5, %cst {dimension_numbers = #tpu.dot_dimension_numbers<[1], [0], [0], [1], [0, 0, 1, 1], [], []>} : vector<64x32xbf16>, vector<32x256xbf16>, vector<64x256xf32> -> vector<64x256xf32>
    %c0_7 = arith.constant 0 : index
    %c0_8 = arith.constant 0 : index
    %7 = vector.load %arg5[%c0_7, %c0_8] : memref<64x1xf32, #tpu.memory_space<vmem>>, vector<64x1xf32>
    %8 = vector.broadcast %7 : vector<64x1xf32> to vector<64x256xf32>
    %9 = arith.addf %6, %8 : vector<64x256xf32>
    %cst_9 = arith.constant 0.00999999977 : f32
    %10 = vector.broadcast %cst_9 : f32 to vector<64x256xf32>
    %11 = arith.mulf %10, %9 : vector<64x256xf32>
    %12 = arith.maximumf %9, %11 : vector<64x256xf32>
    %c0_10 = arith.constant 0 : index
    %c0_11 = arith.constant 0 : index
    %13 = vector.load %arg6[%c0_10, %c0_11] : memref<128x64xbf16, #tpu.memory_space<vmem>>, vector<128x64xbf16>
    %14 = arith.truncf %12 : vector<64x256xf32> to vector<64x256xbf16>
    %cst_12 = arith.constant dense<0.000000e+00> : vector<128x256xf32>
    %15 = tpu.matmul %13, %14, %cst_12 {dimension_numbers = #tpu.dot_dimension_numbers<[1], [0], [0], [1], [0, 0, 1, 1], [], []>} : vector<128x64xbf16>, vector<64x256xbf16>, vector<128x256xf32> -> vector<128x256xf32>
    %c0_13 = arith.constant 0 : index
    %c0_14 = arith.constant 0 : index
    %16 = vector.load %arg7[%c0_13, %c0_14] : memref<128x1xf32, #tpu.memory_space<vmem>>, vector<128x1xf32>
    %17 = vector.broadcast %16 : vector<128x1xf32> to vector<128x256xf32>
    %18 = arith.addf %15, %17 : vector<128x256xf32>
    %19 = vector.extract_strided_slice %18 {offsets = [0, 0], sizes = [64, 256], strides = [1, 1]} : vector<128x256xf32> to vector<64x256xf32>
    %20 = vector.extract_strided_slice %18 {offsets = [64, 0], sizes = [64, 256], strides = [1, 1]} : vector<128x256xf32> to vector<64x256xf32>
    %21 = arith.mulf %3, %19 : vector<64x256xf32>
    %22 = arith.addf %21, %20 : vector<64x256xf32>
    %c0_15 = arith.constant 0 : index
    %c0_16 = arith.constant 0 : index
    %c0_17 = arith.constant 0 : index
    %23 = vector.load %arg8[%c0_15, %c0_16, %c0_17] : memref<1x64x256xf32, #tpu.memory_space<vmem>>, vector<1x64x256xf32>
    %24 = vector.shape_cast %23 : vector<1x64x256xf32> to vector<64x256xf32>
    %25 = vector.shape_cast %22 : vector<64x256xf32> to vector<1x64x256xf32>
    tpu.vector_store %arg8[%c0_15, %c0_16, %c0_17], %25 {strides = array<i32>} : memref<1x64x256xf32, #tpu.memory_space<vmem>>, vector<1x64x256xf32>,
    return
  }
  func.func @transform_0(%arg0: i32, %arg1: i32) -> (i32, i32, i32) {
    %c0_i32 = arith.constant 0 : i32
    %c0_i32_0 = arith.constant 0 : i32
    return %arg0, %c0_i32, %arg1 : i32, i32, i32
  }
  func.func @transform_1(%arg0: i32, %arg1: i32) -> (i32, i32, i32) {
    %c0_i32 = arith.constant 0 : i32
    %c0_i32_0 = arith.constant 0 : i32
    return %arg0, %c0_i32, %arg1 : i32, i32, i32
  }
  func.func @transform_2(%arg0: i32, %arg1: i32) -> (i32, i32) {
    %c0_i32 = arith.constant 0 : i32
    %c0_i32_0 = arith.constant 0 : i32
    %c0_i32_1 = arith.constant 0 : i32
    return %c0_i32, %c0_i32_0 : i32, i32
  }
  func.func @transform_3(%arg0: i32, %arg1: i32) -> (i32, i32) {
    %c0_i32 = arith.constant 0 : i32
    %c0_i32_0 = arith.constant 0 : i32
    %c0_i32_1 = arith.constant 0 : i32
    return %c0_i32, %c0_i32_0 : i32, i32
  }
  func.func @transform_4(%arg0: i32, %arg1: i32) -> (i32, i32) {
    %c0_i32 = arith.constant 0 : i32
    %c0_i32_0 = arith.constant 0 : i32
    %c0_i32_1 = arith.constant 0 : i32
    return %c0_i32, %c0_i32_0 : i32, i32
  }
  func.func @transform_5(%arg0: i32, %arg1: i32) -> (i32, i32) {
    %c0_i32 = arith.constant 0 : i32
    %c0_i32_0 = arith.constant 0 : i32
    %c0_i32_1 = arith.constant 0 : i32
    return %c0_i32, %c0_i32_0 : i32, i32
  }
  func.func @transform_6(%arg0: i32, %arg1: i32) -> (i32, i32, i32) {
    %c0_i32 = arith.constant 0 : i32
    %c0_i32_0 = arith.constant 0 : i32
    return %arg0, %c0_i32, %arg1 : i32, i32, i32
  }
}

</mosaic_0001>

<bundles_post_ra>
// kernel: tpu_custom_call.1
= control target key start
LH: loop header
LB: loop body
LE: loop exit
PB: predicated region body
PF: predicated region fallthrough
CT: control target
= control target key end

     0   :  { %11 = vsyncpa [#allocation3], 0  ;;  %s1664_s0 = inlined_call_operand.hbm [shape: f32[2,64,256], index: 0, kind: input, shape index: {}]   ;;  %s1665_s1 = inlined_call_operand.vmem [shape: f32[2,32,256], index: 1, kind: input, shape index: {}]   ;;  %s1666_s2 = inlined_call_operand.vmem [shape: bf16[64,32], index: 2, kind: input, shape index: {}]   ;;  %s1667_s3 = inlined_call_operand.vmem [shape: f32[64,1], index: 3, kind: input, shape index: {}]   ;;  %s1668_s4 = inlined_call_operand.vmem [shape: bf16[128,64], index: 4, kind: input, shape index: {}]   ;;  %s1669_s5 = inlined_call_operand.vmem [shape: f32[128,1], index: 5, kind: input, shape index: {}]   ;;  %s1670_s6 = inlined_call_operand.hbm [shape: f32[2,64,256], index: 6, kind: output, shape index: {}]  }
   0x1   :  { %13 = vsyncpa [#allocation3 + $0x1], 0 }
   0x2   :  { %14 = vsyncpa [#allocation4], 0 }
   0x3   :  { %16 = vsyncpa [#allocation4 + $0x1], 0  ;;  %s1326_s21 = smov 0   ;;  %s1328_s22 = smov 0  }
   0x4   :  { %s1330_s23 = smov 0   ;;  %s1332_s24 = smov 0  }
   0x5   :  { %s1334_s25 = smov 0   ;;  %s1336_s26 = smov 0  }
   0x6 LB: > { %s990_s27 = sadd.s32 4294967295, %s1284_s26   ;;  %s991_s28 = sadd.s32 4294967294, %s1284_s26   ;;  %s1284_s26 = sphi %s1336_s26, %s22_s26   ;;  %s1280_s25 = sphi %s1334_s25, %s1682_s25   ;;  %s1276_s24 = sphi %s1332_s24, %s1681_s24   ;;  %s1272_s23 = sphi %s1330_s23, %s1680_s23   ;;  %s1268_s22 = sphi %s1328_s22, %s1679_s22   ;;  %s1264_s21 = sphi %s1326_s21, %s1678_s21  }
   0x7   : > { %s34_s29 = sadd.s32 1, %s1280_s25  ;;  %s43_s30 = sadd.s32 1, %s1272_s23 }
   0x8   : > { %p36_p0 = scmp.ge.s32.totalorder %s34_s29, 2  ;;  %p50_p1 = scmp.ne.s32.totalorder %s1272_s23, %s1268_s22 }
   0x9   : > { %p51_p2 = scmp.eq.s32.totalorder %s1284_s26, 0  ;;  %p56_p3 = scmp.ne.s32.totalorder %s1268_s22, %s1264_s21 }
   0xa   : > { %s1684_s29 = smov (%p36_p0, %s34_s29), 0  ;;  %p57_p5 = scmp.eq.s32.totalorder %s990_s27, 0 }
   0xb   : > { %1672 = sst [smem:[#allocation8_spill]] %s1684_s29  ;;  %p1367_p4 = por %p51_p2, %p50_p1 }
   0xc   : > { %s38_s8 = ssub.s32 %s1280_s25, %s1684_s29  ;;  %p194_p6 = scmp.eq.s32.totalorder %s990_s27, 1 }
   0xd   : > { %p41_p7 = scmp.eq.s32.totalorder %s38_s8, 0  ;;  %p1373_p8 = por %p57_p5, %p56_p3 }
   0xe   : > { %p1377_p9 = por %p194_p6, %p50_p1  ;;  %p200_p10 = scmp.eq.s32.totalorder %s991_s28, 1 }
   0xf   : > { %s1382_s11 = scalar_select %p41_p7, %s1272_s23, %s43_s30  }
  0x10   : > { %p1384_p11 = por %p200_p10, %p56_p3  ;;  %p993_p12 = scmp.ge.s32.totalorder %s1284_s26, 2 }
  0x11   : > { %p1114_p13 = scmp.lt.s32.totalorder %s1284_s26, 2  ;;  %s232_s13 = sand.u32 1, %s1272_s23  }
  0x12   : > { %s994_s14 = sshll.u32 %s232_s13, 7  ;;  %s1079_s15 = sshll.u32 %s1280_s25, 7 }
  0x13   : > { %s243_s18 = scalar_lea.hbm %s1664_s0, %s1079_s15  ;;  %s236_s19 = scalar_lea.vmem [#allocation2], %s994_s14 }
  0x14   : > { %s246_s20 = sshll.u32 %s236_s19, 4  ;;  %s244_s27 = sshll.u32 %s243_s18, 4  ;;  %s247_s20 = int_to_ptr.vmem [resolvable:$true] %s246_s20  ;;  %s245_s27 = int_to_ptr.hbm [resolvable:$true] %s244_s27 }
  0x15   : > { %p1107_p0 = pnand %p1114_p13, %p1367_p4  ;;  %p997_p1 = scmp.ge.s32.totalorder %s1284_s26, 1 }
  0x16   : > { %s233_s28 = scalar_lea.sflag [#allocation3], %s232_s13  ;;  %s1286_s30 = smov 256  }
  0x17   : > { %s1287_s8 = smov 16   ;;  %p267_p2 = scmp.lt.s32.totalorder %s1284_s26, 3 }
  0x18   : > { %1109 = dma.hbm_to_vmem [thread:$0]  (!%p1107_p0), %s245_s27, 2048, %s247_s20, %s233_s28, %s1286_s30, %s1286_s30, %s1287_s8  }
  0x19   : > { %p268_p3 = pnand %p997_p1, %p267_p2 }
  0x1a   : > { %s1400_s29 = sand.u32 (!%p268_p3), 1, %s1268_s22  }
  0x1b   : > { %271 = sbr.rel (%p268_p3) target bundleno = 483 (0x1e3), region = 44  ;;  %s998_s14 = sshll.u32 (!%p268_p3), %s1400_s29, 7 }
  0x1c   : > { %s274_s15 = scalar_lea.sflag (!%p268_p3), [#allocation3], %s1400_s29  ;;  %s1406_s7 = scalar_lea.vmem (!%p268_p3), [#allocation2], %s998_s14 }
  0x20   : > { %1255 = dma.done.wait (%p1373_p8), %s274_s15, 2048  }
  0x21   : > { %1257 = vsyncadd (%p1373_p8), %s274_s15, 4294965248  ;;  %p318_p4 = scmp.lt.s32.totalorder %s1276_s24, 1  ;;  %v1288_v0 = vmov 0   ;;  %v371_v6 = vld [vmem:[%s1667_s3 + $0x30] sm:$0xff]  ;;  %v369_v13 = vld [vmem:[%s1667_s3 + $0x20] sm:$0xff]  ;;  %vm433_vm0 = vcmask 261120  }
  0x22   : > { %1169 = vset.pattern.permute.xlu0 %v1288_v0  ;;  %1170 = vset.pattern.permute.xlu1 %v1288_v0  ;;  %v1081_v15 = vld [vmem:[%s1666_s2] sm:$0xff]  ;;  %v372_v16 = vld [vmem:[%s1667_s3 + $0x38] sm:$0xff]  ;;  %v370_v17 = vld [vmem:[%s1667_s3 + $0x28] sm:$0xff]  ;;  %vm696_vm1 = vcmask 523264   ;;  %s1575_s9 = scalar_lea.vmem [#allocation5], %s998_s14  ;;  %s1093_s14 = sshll.u32 %s1276_s24, 7 }
  0x23   : > { %s319_s13 = scalar_select %p318_p4, %s1276_s24, 1  ;;  %1171 = vset.pattern.permute.xlu2 %v1288_v0  ;;  %405 = vperm.xlu0 %1169, %v371_v6   ;;  %v367_v18 = vld [vmem:[%s1667_s3 + $0x10] sm:$0xff]  ;;  %v365_v19 = vld [vmem:[%s1667_s3] sm:$0xff]  ;;  %v366_v20 = vld [vmem:[%s1667_s3 + $0x8] sm:$0xff] }
  0x24   : > { %395 = vperm.xlu1 %1170, %v369_v13   ;;  %385 = vperm.xlu2 %1171, %v367_v18   ;;  %v368_v21 = vld [vmem:[%s1667_s3 + $0x18] sm:$0xff]  ;;  %v1082_v22 = vld [vmem:[%s1666_s2 + $0x8] sm:$0xff]  ;;  %v562_v24 = vld [vmem:[%s1669_s5 + $0x10] sm:$0xff]  ;;  %s881_s28 = scalar_lea.hbm %s1670_s6, %s1093_s14  ;;  %s882_s24 = sshll.u32 %s1575_s9, 4  ;;  %s883_s24 = int_to_ptr.vmem [resolvable:$true] %s882_s24 }
  0x25   : > { %s1080_s16 = sshll.u32 %s319_s13, 6  ;;  %v561_v23 = vld [vmem:[%s1669_s5 + $0x8] sm:$0xff]  ;;  %v560_v25 = vld [vmem:[%s1669_s5] sm:$0xff]  ;;  %v563_v28 = vld [vmem:[%s1669_s5 + $0x18] sm:$0xff]  ;;  %s884_s30 = sshll.u32 %s881_s28, 4  ;;  %s885_s30 = int_to_ptr.hbm [resolvable:$true] %s884_s30 }
  0x26   : > { %s325_s19 = scalar_lea.vmem %s1665_s1, %s1080_s16  ;;  %v564_v26 = vld [vmem:[%s1669_s5 + $0x20] sm:$0xff]  ;;  %v565_v27 = vld [vmem:[%s1669_s5 + $0x28] sm:$0xff]  ;;  %v1083_v29 = vld [vmem:[%s1666_s2 + $0x10] sm:$0xff]  ;;  %s868_s8 = scalar_lea.sflag [#allocation4], %s1400_s29 }
  0x27   : > { %v333_v1 = vld [vmem:[%s325_s19 + $0x20] sm:$0xff]  ;;  %v335_v2 = vld [vmem:[%s325_s19 + $0x30] sm:$0xff]  ;;  %v334_v3 = vld [vmem:[%s325_s19 + $0x28] sm:$0xff]  ;;  %s1216_s15 = sshra.s32 %s885_s30, 4  ;;  %s1222_s17 = scalar_lea.hbm %s1670_s6, 256  ;;  %s1217_s15 = int_to_ptr.hbm [resolvable:$true] %s1216_s15 }
  0x28   : > { %v363_v4 = vpack.c.bf16 %v335_v2, %v333_v1  ;;  %v336_v5 = vld [vmem:[%s325_s19 + $0x38] sm:$0xff]  ;;  %v329_v7 = vld [vmem:[%s325_s19] sm:$0xff]  ;;  %v331_v9 = vld [vmem:[%s325_s19 + $0x10] sm:$0xff]  ;;  %p1223_p8 = scmp.lt.s32.totalorder %s1217_s15, %s1670_s6 }
  0x29   : > { %v364_v8 = vpack.c.bf16 %v336_v5, %v334_v3  ;;  %v330_v10 = vld [vmem:[%s325_s19 + $0x8] sm:$0xff]  ;;  %v332_v11 = vld [vmem:[%s325_s19 + $0x18] sm:$0xff]  ;;  %v361_v12 = vpack.c.bf16 %v331_v9, %v329_v7  ;;  %v568_v31 = vld [vmem:[%s1669_s5 + $0x40] sm:$0xff] }
  0x2a   : > { %452 = vmatpush.bf16.msra.mxu0 %v363_v4  ;;  %v362_v14 = vpack.c.bf16 %v332_v11, %v330_v10  ;;  %v567_v30 = vld [vmem:[%s1669_s5 + $0x38] sm:$0xff]  ;;  %v566_v32 = vld [vmem:[%s1669_s5 + $0x30] sm:$0xff]  ;;  %v569_v35 = vld [vmem:[%s1669_s5 + $0x48] sm:$0xff] }
  0x2b   : > { %481 = vmatpush.bf16.msra.mxu1 %v364_v8  ;;  %410 = vperm.xlu0 %1169, %v372_v16   ;;  %v570_v33 = vld [vmem:[%s1669_s5 + $0x50] sm:$0xff]  ;;  %v571_v34 = vld [vmem:[%s1669_s5 + $0x58] sm:$0xff]  ;;  %v573_v37 = vld [vmem:[%s1669_s5 + $0x68] sm:$0xff] }
  0x2c   : > { %400 = vperm.xlu1 %1170, %v370_v17   ;;  %390 = vperm.xlu2 %1171, %v368_v21   ;;  %v1084_v36 = vld [vmem:[%s1666_s2 + $0x18] sm:$0xff]  ;;  %v574_v38 = vld [vmem:[%s1669_s5 + $0x70] sm:$0xff]  ;;  %v572_v39 = vld [vmem:[%s1669_s5 + $0x60] sm:$0xff] }
  0x2d   : > { %v575_v40 = vld [vmem:[%s1669_s5 + $0x78] sm:$0xff] }
  0x2e   : > { %453 = vmatpush.bf16.msra.mxu0 %v361_v12 }
  0x2f   : > { %482 = vmatpush.bf16.msra.mxu1 %v362_v14 }
  0x31   : > { %1018 = vmatmul.msk.bf16.vlgmr.msra.gmra.mxu0 %vm433_vm0, %v1081_v15 }
  0x32   : > { %1022 = vmatmul.msk.bf16.vlgmr.msra.gmra.mxu1 %vm433_vm0, %v1081_v15 }
  0x33   : > { %375 = vperm.xlu0 %1169, %v365_v19  }
  0x34   : > { %380 = vperm.xlu1 %1170, %v366_v20   ;;  %578 = vperm.xlu2 %1171, %v560_v25  }
  0x3b   : > { %583 = vperm.xlu0 %1169, %v561_v23  }
  0x3c   : > { %588 = vperm.xlu1 %1170, %v562_v24   ;;  %593 = vperm.xlu2 %1171, %v563_v28  }
  0x41   : > { %1019 = vmatmul.msk.bf16.gmra.mxu0 %vm433_vm0, %v1082_v22 }
  0x42   : > { %1023 = vmatmul.msk.bf16.gmra.mxu1 %vm433_vm0, %v1082_v22 }
  0x43   : > { %598 = vperm.xlu0 %1169, %v564_v26  }
  0x44   : > { %603 = vperm.xlu1 %1170, %v565_v27   ;;  %608 = vperm.xlu2 %1171, %v566_v32  }
  0x4b   : > { %613 = vperm.xlu0 %1169, %v567_v30  }
  0x4c   : > { %618 = vperm.xlu1 %1170, %v568_v31   ;;  %623 = vperm.xlu2 %1171, %v569_v35  }
  0x51   : > { %1020 = vmatmul.msk.bf16.gmra.mxu0 %vm433_vm0, %v1083_v29 }
  0x52   : > { %1024 = vmatmul.msk.bf16.gmra.mxu1 %vm433_vm0, %v1083_v29 }
  0x53   : > { %628 = vperm.xlu0 %1169, %v570_v33  }
  0x54   : > { %633 = vperm.xlu1 %1170, %v571_v34   ;;  %638 = vperm.xlu2 %1171, %v572_v39  }
  0x5b   : > { %643 = vperm.xlu0 %1169, %v573_v37  }
  0x5c   : > { %648 = vperm.xlu1 %1170, %v574_v38   ;;  %653 = vperm.xlu2 %1171, %v575_v40  }
  0x61   : > { %1021 = vmatmul.msk.bf16.gmra.mxu0 %vm433_vm0, %v1084_v36 }
  0x62   : > { %1025 = vmatmul.msk.bf16.gmra.mxu1 %vm433_vm0, %v1084_v36 }
  0x7e   : > { %v386_v55 = vpop.permute.xlu2 %385 }
  0x86   : > { %v391_v5 = vpop.permute.xlu2 %390 }
  0x95   : > { %v406_v54 = vpop.permute.xlu0 %405 }
  0x96   : > { %v396_v51 = vpop.permute.xlu1 %395 }
  0x9d   : > { %v411_v59 = vpop.permute.xlu0 %410 }
  0x9e   : > { %v401_v58 = vpop.permute.xlu1 %400 }
  0xa5   : > { %v376_v20 = vpop.permute.xlu0 %375 }
  0xa6   : > { %v381_v12 = vpop.permute.xlu1 %380 }
  0xae   : > { %v455_v41 = vpop.f32.mrf.mxu0 }
  0xaf   : > { %v484_v42 = vpop.f32.mrf.mxu1  ;;  %v456_v33 = vadd.f32 %v455_v41, %v376_v20 }
  0xb0   : > { %v485_v36 = vadd.f32 %v484_v42, %v376_v20 }
  0xb2   : > { %v505_v41 = vmul.f32 0.01, %v485_v36 }
  0xb6   : > { %v457_v43 = vpop.f32.mrf.mxu0 }
  0xb7   : > { %v486_v44 = vpop.f32.mrf.mxu1  ;;  %v458_v25 = vadd.f32 %v457_v43, %v381_v12 }
  0xb8   : > { %v487_v29 = vadd.f32 %v486_v44, %v381_v12  ;;  %v504_v44 = vmul.f32 0.01, %v456_v33 }
  0xb9   : > { %v506_v39 = vmul.f32 0.01, %v458_v25 }
  0xbe   : > { %v460_v45 = vpop.f32.mrf.mxu0 }
  0xbf   : > { %v489_v46 = vpop.f32.mrf.mxu1  ;;  %v461_v16 = vadd.f32 %v460_v45, %v386_v55  ;;  %v507_v45 = vmul.f32 0.01, %v487_v29 }
  0xc0   : > { %v490_v21 = vadd.f32 %v489_v46, %v386_v55 }
  0xc1   : > { %v508_v34 = vmul.f32 0.01, %v461_v16 }
  0xc2   : > { %v509_v37 = vmul.f32 0.01, %v490_v21 }
  0xc6   : > { %v462_v47 = vpop.f32.mrf.mxu0 }
  0xc7   : > { %v491_v48 = vpop.f32.mrf.mxu1  ;;  %v463_v9 = vadd.f32 %v462_v47, %v391_v5 }
  0xc8   : > { %v492_v13 = vadd.f32 %v491_v48, %v391_v5  ;;  %v524_v48 = vmax.f32 %v461_v16, %v508_v34 }
  0xc9   : > { %v510_v26 = vmul.f32 0.01, %v463_v9 }
  0xca   : > { %v511_v30 = vmul.f32 0.01, %v492_v13 }
  0xcb   : > { %v526_v40 = vmax.f32 %v463_v9, %v510_v26  ;;  %v584_v9 = vpop.permute.xlu0 %583 }
  0xcc   : > { %v527_v46 = vmax.f32 %v492_v13, %v511_v30 }
  0xcd   : > { %v554_v42 = vpack.c.bf16 %v526_v40, %v524_v48 }
  0xce   : > { %v465_v49 = vpop.f32.mrf.mxu0 }
  0xcf   : > { %v494_v50 = vpop.f32.mrf.mxu1  ;;  %v466_v1 = vadd.f32 %v465_v49, %v396_v51  ;;  %v525_v49 = vmax.f32 %v490_v21, %v509_v37 }
  0xd0   : > { %v495_v6 = vadd.f32 %v494_v50, %v396_v51  ;;  %v522_v50 = vmax.f32 %v458_v25, %v506_v39  ;;  %v523_v51 = vmax.f32 %v487_v29, %v507_v45 }
  0xd1   : > { %v512_v17 = vmul.f32 0.01, %v466_v1 }
  0xd2   : > { %v513_v22 = vmul.f32 0.01, %v495_v6 }
  0xd3   : > { %v528_v35 = vmax.f32 %v466_v1, %v512_v17  ;;  %v1567_v16 = vpop.permute.xlu0 %598 }
  0xd4   : > { %v529_v38 = vmax.f32 %v495_v6, %v513_v22  ;;  %v589_v6 = vpop.permute.xlu1 %588  ;;  %v338_v22 = vld [vmem:[%s1406_s7 + $0x8] sm:$0xff] }
  0xd6   : > { %v467_v52 = vpop.f32.mrf.mxu0 }
  0xd7   : > { %v496_v53 = vpop.f32.mrf.mxu1  ;;  %v468_v62 = vadd.f32 %v467_v52, %v401_v58  ;;  %v555_v52 = vpack.c.bf16 %v527_v46, %v525_v49 }
  0xd8   : > { %v497_v63 = vadd.f32 %v496_v53, %v401_v58  ;;  %v520_v53 = vmax.f32 %v456_v33, %v504_v44  ;;  %v1087_v58 = vld [vmem:[%s1668_s4 + $0x10] sm:$0xff] }
  0xd9   : > { %v514_v10 = vmul.f32 0.01, %v468_v62 }
  0xda   : > { %v515_v14 = vmul.f32 0.01, %v497_v63  ;;  %v552_v55 = vpack.c.bf16 %v522_v50, %v520_v53 }
  0xdb   : > { %v530_v27 = vmax.f32 %v468_v62, %v514_v10  ;;  %v1090_v62 = vld [vmem:[%s1668_s4 + $0x28] sm:$0xff]  ;;  %v1578_v34 = vpop.permute.xlu0 %613 }
  0xdc   : > { %v531_v31 = vmax.f32 %v497_v63, %v515_v14  ;;  %v1091_v63 = vld [vmem:[%s1668_s4 + $0x30] sm:$0xff]  ;;  %v1561_v13 = vpop.permute.xlu1 %603 }
  0xdd   : > { %v556_v43 = vpack.c.bf16 %v530_v27, %v528_v35  ;;  %v339_v35 = vld [vmem:[%s1406_s7 + $0x10] sm:$0xff] }
  0xde   : > { %v470_v56 = vpop.f32.mrf.mxu0  ;;  %v557_v47 = vpack.c.bf16 %v531_v31, %v529_v38  ;;  %v340_v38 = vld [vmem:[%s1406_s7 + $0x18] sm:$0xff] }
  0xdf   : > { %v499_v57 = vpop.f32.mrf.mxu1  ;;  %v471_v60 = vadd.f32 %v470_v56, %v406_v54 }
  0xe0   : > { %v500_v61 = vadd.f32 %v499_v57, %v406_v54  ;;  %v521_v54 = vmax.f32 %v485_v36, %v505_v41  ;;  %v1085_v57 = vld [vmem:[%s1668_s4] sm:$0xff] }
  0xe1   : > { %v516_v2 = vmul.f32 0.01, %v471_v60 }
  0xe2   : > { %v517_v7 = vmul.f32 0.01, %v500_v61  ;;  %v553_v56 = vpack.c.bf16 %v523_v51, %v521_v54 }
  0xe3   : > { %v532_v18 = vmax.f32 %v471_v60, %v516_v2  ;;  %v1088_v60 = vld [vmem:[%s1668_s4 + $0x18] sm:$0xff]  ;;  %v629_v53 = vpop.permute.xlu0 %628 }
  0xe4   : > { %v533_v23 = vmax.f32 %v500_v61, %v517_v7  ;;  %v1089_v61 = vld [vmem:[%s1668_s4 + $0x20] sm:$0xff] }
  0xe6   : > { %v472_v0 = vpop.f32.mrf.mxu0 }
  0xe7   : > { %v473_v3 = vadd.f32 %v472_v0, %v411_v59  ;;  %v501_v4 = vpop.f32.mrf.mxu1  ;;  %v1092_v0 = vld [vmem:[%s1668_s4 + $0x38] sm:$0xff] }
  0xe8   : > { %v502_v8 = vadd.f32 %v501_v4, %v411_v59  ;;  %v1086_v59 = vld [vmem:[%s1668_s4 + $0x8] sm:$0xff]  ;;  %v579_v4 = vpop.permute.xlu2 %578 }
  0xe9   : > { %v518_v11 = vmul.f32 0.01, %v473_v3 }
  0xea   : > { %v519_v15 = vmul.f32 0.01, %v502_v8 }
  0xeb   : > { %v534_v19 = vmax.f32 %v473_v3, %v518_v11 }
  0xec   : > { %v535_v24 = vmax.f32 %v502_v8, %v519_v15 }
  0xed   : > { %v558_v28 = vpack.c.bf16 %v534_v19, %v532_v18  ;;  %v337_v19 = vld [vmem:[%s1406_s7] sm:$0xff] }
  0xee   : > { %v559_v32 = vpack.c.bf16 %v535_v24, %v533_v23  ;;  %v619_v24 = vpop.permute.xlu1 %618 }
  0xef   : > { %725 = vmatpush.bf16.msrb.mxu0 %v558_v28  ;;  %1094 = vmatpush.bf16.msra.mxu2 %v558_v28 }
  0xf0   : > { %774 = vmatpush.bf16.msrb.mxu1 %v559_v32  ;;  %1098 = vmatpush.bf16.msra.mxu3 %v559_v32  ;;  %v594_v10 = vpop.permute.xlu2 %593 }
  0xf3   : > { %726 = vmatpush.bf16.msrb.mxu0 %v556_v43  ;;  %1095 = vmatpush.bf16.msra.mxu2 %v556_v43 }
  0xf4   : > { %775 = vmatpush.bf16.msrb.mxu1 %v557_v47  ;;  %1099 = vmatpush.bf16.msra.mxu3 %v557_v47 }
  0xf7   : > { %727 = vmatpush.bf16.msrb.mxu0 %v554_v42  ;;  %1096 = vmatpush.bf16.msra.mxu2 %v554_v42  ;;  %v341_v42 = vld [vmem:[%s1406_s7 + $0x20] sm:$0xff] }
  0xf8   : > { %776 = vmatpush.bf16.msrb.mxu1 %v555_v52  ;;  %1100 = vmatpush.bf16.msra.mxu3 %v555_v52  ;;  %v1569_v17 = vpop.permute.xlu2 %608  ;;  %v342_v52 = vld [vmem:[%s1406_s7 + $0x28] sm:$0xff] }
  0xfb   : > { %728 = vmatpush.bf16.msrb.mxu0 %v552_v55  ;;  %1097 = vmatpush.bf16.msra.mxu2 %v552_v55 }
  0xfc   : > { %777 = vmatpush.bf16.msrb.mxu1 %v553_v56  ;;  %1101 = vmatpush.bf16.msra.mxu3 %v553_v56 }
  0xfe   : > { %1058 = vmatmul.msk.bf16.vlgmr.msrb.gmra.mxu0 %vm696_vm1, %v1085_v57  ;;  %1060 = vmatmul.msk.bf16.vlgmr.msra.gmra.mxu2 %vm696_vm1, %v1087_v58 }
  0xff   : > { %1066 = vmatmul.msk.bf16.vlgmr.msrb.gmra.mxu1 %vm696_vm1, %v1085_v57  ;;  %1068 = vmatmul.msk.bf16.vlgmr.msra.gmra.mxu3 %vm696_vm1, %v1087_v58 }
 0x100   : > { %v624_v37 = vpop.permute.xlu2 %623 }
 0x10e   : > { %1059 = vmatmul.msk.bf16.gmra.mxu0 %vm696_vm1, %v1086_v59  ;;  %1061 = vmatmul.msk.bf16.gmra.mxu2 %vm696_vm1, %v1088_v60 }
 0x10f   : > { %1067 = vmatmul.msk.bf16.gmra.mxu1 %vm696_vm1, %v1086_v59  ;;  %1069 = vmatmul.msk.bf16.gmra.mxu3 %vm696_vm1, %v1088_v60 }
 0x11e   : > { %1062 = vmatmul.msk.bf16.gmra.mxu2 %vm696_vm1, %v1089_v61 }
 0x11f   : > { %1070 = vmatmul.msk.bf16.gmra.mxu3 %vm696_vm1, %v1089_v61 }
 0x12e   : > { %1063 = vmatmul.msk.bf16.gmra.mxu2 %vm696_vm1, %v1090_v62 }
 0x12f   : > { %1071 = vmatmul.msk.bf16.gmra.mxu3 %vm696_vm1, %v1090_v62 }
 0x13e   : > { %1064 = vmatmul.msk.bf16.gmra.mxu2 %vm696_vm1, %v1091_v63 }
 0x13f   : > { %1072 = vmatmul.msk.bf16.gmra.mxu3 %vm696_vm1, %v1091_v63 }
 0x14e   : > { %1065 = vmatmul.msk.bf16.gmra.mxu2 %vm696_vm1, %v1092_v0 }
 0x14f   : > { %1073 = vmatmul.msk.bf16.gmra.mxu3 %vm696_vm1, %v1092_v0 }
 0x17b   : > { %v730_v11 = vpop.f32.mrf.mxu0 }
 0x17c   : > { %v779_v12 = vpop.f32.mrf.mxu1  ;;  %v731_v18 = vadd.f32 %v730_v11, %v579_v4  ;;  %v634_v11 = vpop.permute.xlu1 %633 }
 0x17d   : > { %v780_v20 = vadd.f32 %v779_v12, %v579_v4  ;;  %v343_v4 = vld [vmem:[%s1406_s7 + $0x30] sm:$0xff] }
 0x17e   : > { %v819_v26 = vmul.f32 %v731_v18, %v337_v19 }
 0x17f   : > { %v820_v29 = vmul.f32 %v780_v20, %v338_v22 }
 0x181   : > { %v1549_v1 = vpop.f32.mrf.mxu2 }
 0x182   : > { %v1551_v2 = vpop.f32.mrf.mxu3 }
 0x183   : > { %v732_v21 = vpop.f32.mrf.mxu0 }
 0x184   : > { %v781_v23 = vpop.f32.mrf.mxu1  ;;  %v733_v33 = vadd.f32 %v732_v21, %v584_v9 }
 0x185   : > { %v782_v36 = vadd.f32 %v781_v23, %v584_v9  ;;  %v344_v9 = vld [vmem:[%s1406_s7 + $0x38] sm:$0xff] }
 0x186   : > { %v821_v43 = vmul.f32 %v733_v33, %v339_v35 }
 0x187   : > { %v822_v44 = vmul.f32 %v782_v36, %v340_v38  ;;  %v348_v38 = vld [vmem:[%s1406_s7 + $0x58] sm:$0xff] }
 0x189   : > { %v1553_v3 = vpop.f32.mrf.mxu2 }
 0x18a   : > { %v1555_v5 = vpop.f32.mrf.mxu3 }
 0x18b   : > { %v735_v39 = vpop.f32.mrf.mxu0 }
 0x18c   : > { %v784_v45 = vpop.f32.mrf.mxu1  ;;  %v736_v50 = vadd.f32 %v735_v39, %v589_v6  ;;  %v644_v39 = vpop.permute.xlu0 %643 }
 0x18d   : > { %v785_v51 = vadd.f32 %v784_v45, %v589_v6 }
 0x18e   : > { %v823_v55 = vmul.f32 %v736_v50, %v341_v42  ;;  %v649_v50 = vpop.permute.xlu1 %648 }
 0x18f   : > { %v824_v58 = vmul.f32 %v785_v51, %v342_v52 }
 0x191   : > { %v1557_v7 = vpop.f32.mrf.mxu2 }
 0x192   : > { %v1559_v8 = vpop.f32.mrf.mxu3 }
 0x193   : > { %v737_v59 = vpop.f32.mrf.mxu0 }
 0x194   : > { %v786_v61 = vpop.f32.mrf.mxu1  ;;  %v738_v0 = vadd.f32 %v737_v59, %v594_v10 }
 0x195   : > { %v787_v6 = vadd.f32 %v786_v61, %v594_v10  ;;  %v345_v10 = vld [vmem:[%s1406_s7 + $0x40] sm:$0xff] }
 0x196   : > { %v825_v18 = vmul.f32 %v738_v0, %v343_v4 }
 0x197   : > { %v826_v21 = vmul.f32 %v787_v6, %v344_v9 }
 0x199   : > { %v1563_v14 = vpop.f32.mrf.mxu2 }
 0x19a   : > { %v1565_v15 = vpop.f32.mrf.mxu3 }
 0x1a1   : > { %v750_v25 = vpop.f32.mrf.mxu2 }
 0x1a2   : > { %v751_v27 = vadd.f32 %v750_v25, %v619_v24  ;;  %v799_v28 = vpop.f32.mrf.mxu3  ;;  %v741_v25 = vadd.f32 %v1549_v1, %v1567_v16 }
 0x1a3   : > { %v800_v30 = vadd.f32 %v799_v28, %v619_v24  ;;  %v639_v28 = vpop.permute.xlu2 %638 }
 0x1a4   : > { %v835_v31 = vadd.f32 %v819_v26, %v751_v27  ;;  %v790_v26 = vadd.f32 %v1551_v2, %v1567_v16  ;;  %v346_v27 = vld [vmem:[%s1406_s7 + $0x48] sm:$0xff]  ;;  %v347_v2 = vld [vmem:[%s1406_s7 + $0x50] sm:$0xff]  ;;  %v792_v16 = vadd.f32 %v1555_v5, %v1561_v13  ;;  %v349_v5 = vld [vmem:[%s1406_s7 + $0x60] sm:$0xff] }
 0x1a5   : > { %v836_v32 = vadd.f32 %v820_v29, %v800_v30  ;;  %v827_v30 = vmul.f32 %v741_v25, %v345_v10 }
 0x1a6   : > { %851 = vst [vmem:[%s1575_s9] sm:$0xff] %v835_v31  ;;  %v828_v33 = vmul.f32 %v790_v26, %v346_v27 }
 0x1a7   : > { %852 = vst [vmem:[%s1575_s9 + $0x8] sm:$0xff] %v836_v32 }
 0x1a9   : > { %v752_v40 = vpop.f32.mrf.mxu2 }
 0x1aa   : > { %v753_v46 = vadd.f32 %v752_v40, %v624_v37  ;;  %v801_v47 = vpop.f32.mrf.mxu3 }
 0x1ab   : > { %v802_v48 = vadd.f32 %v801_v47, %v624_v37  ;;  %v743_v37 = vadd.f32 %v1553_v3, %v1561_v13  ;;  %v830_v47 = vmul.f32 %v792_v16, %v348_v38  ;;  %v795_v13 = vadd.f32 %v1559_v8, %v1569_v17  ;;  %v351_v8 = vld [vmem:[%s1406_s7 + $0x70] sm:$0xff]  ;;  %v654_v59 = vpop.permute.xlu2 %653 }
 0x1ac   : > { %v837_v41 = vadd.f32 %v821_v43, %v753_v46 }
 0x1ad   : > { %v838_v49 = vadd.f32 %v822_v44, %v802_v48  ;;  %v829_v43 = vmul.f32 %v743_v37, %v347_v2 }
 0x1ae   : > { %853 = vst [vmem:[%s1575_s9 + $0x10] sm:$0xff] %v837_v41  ;;  %v746_v41 = vadd.f32 %v1557_v7, %v1569_v17  ;;  %v797_v17 = vadd.f32 %v1565_v15, %v1578_v34 }
 0x1af   : > { %854 = vst [vmem:[%s1575_s9 + $0x18] sm:$0xff] %v838_v49  ;;  %v350_v49 = vld [vmem:[%s1406_s7 + $0x68] sm:$0xff] }
 0x1b0   : > { %v831_v51 = vmul.f32 %v746_v41, %v349_v5 }
 0x1b1   : > { %v755_v54 = vpop.f32.mrf.mxu2 }
 0x1b2   : > { %v756_v56 = vadd.f32 %v755_v54, %v629_v53  ;;  %v804_v57 = vpop.f32.mrf.mxu3  ;;  %v832_v54 = vmul.f32 %v795_v13, %v350_v49 }
 0x1b3   : > { %v805_v60 = vadd.f32 %v804_v57, %v629_v53  ;;  %v748_v57 = vadd.f32 %v1563_v14, %v1578_v34 }
 0x1b4   : > { %v839_v62 = vadd.f32 %v823_v55, %v756_v56 }
 0x1b5   : > { %v840_v63 = vadd.f32 %v824_v58, %v805_v60  ;;  %v352_v58 = vld [vmem:[%s1406_s7 + $0x78] sm:$0xff]  ;;  %v833_v61 = vmul.f32 %v748_v57, %v351_v8  ;;  %s1218_s7 = scalar_lea.hbm %s1217_s15, 128 }
 0x1b6   : > { %855 = vst [vmem:[%s1575_s9 + $0x20] sm:$0xff] %v839_v62  ;;  %p1219_p5 = scmp.ne.s32.totalorder %s1217_s15, %s1218_s7  ;;  %p1224_p10 = scmp.lt.s32.totalorder %s1222_s17, %s1218_s7 }
 0x1b7   : > { %856 = vst [vmem:[%s1575_s9 + $0x28] sm:$0xff] %v840_v63  ;;  %v834_v63 = vmul.f32 %v797_v17, %v352_v58 }
 0x1b8   : > { %p1220_p6 = pnand %p1219_p5, %p1377_p9  ;;  %p1225_p13 = por %p1224_p10, %p1223_p8 }
 0x1b9   : > { %v757_v12 = vpop.f32.mrf.mxu2 }
 0x1ba   : > { %v758_v19 = vadd.f32 %v757_v12, %v634_v11  ;;  %v806_v20 = vpop.f32.mrf.mxu3  ;;  %p1221_p7 = pneg %p1220_p6 }
 0x1bb   : > { %v807_v22 = vadd.f32 %v806_v20, %v634_v11 }
 0x1bc   : > { %v841_v23 = vadd.f32 %v825_v18, %v758_v19  ;;  %p1226_p0 = pnand %p1225_p13, %p1221_p7 }
 0x1bd   : > { %v842_v24 = vadd.f32 %v826_v21, %v807_v22 }
 0x1be   : > { %857 = vst [vmem:[%s1575_s9 + $0x30] sm:$0xff] %v841_v23 }
 0x1bf   : > { %858 = vst [vmem:[%s1575_s9 + $0x38] sm:$0xff] %v842_v24 }
 0x1c1   : > { %v760_v29 = vpop.f32.mrf.mxu2 }
 0x1c2   : > { %v761_v31 = vadd.f32 %v760_v29, %v639_v28  ;;  %v809_v32 = vpop.f32.mrf.mxu3 }
 0x1c3   : > { %v810_v35 = vadd.f32 %v809_v32, %v639_v28 }
 0x1c4   : > { %v843_v36 = vadd.f32 %v827_v30, %v761_v31 }
 0x1c5   : > { %v844_v1 = vadd.f32 %v828_v33, %v810_v35 }
 0x1c6   : > { %859 = vst [vmem:[%s1575_s9 + $0x40] sm:$0xff] %v843_v36 }
 0x1c7   : > { %860 = vst [vmem:[%s1575_s9 + $0x48] sm:$0xff] %v844_v1 }
 0x1c9   : > { %v762_v40 = vpop.f32.mrf.mxu2 }
 0x1ca   : > { %v763_v45 = vadd.f32 %v762_v40, %v644_v39  ;;  %v811_v46 = vpop.f32.mrf.mxu3 }
 0x1cb   : > { %v812_v44 = vadd.f32 %v811_v46, %v644_v39 }
 0x1cc   : > { %v845_v3 = vadd.f32 %v829_v43, %v763_v45 }
 0x1cd   : > { %v846_v48 = vadd.f32 %v830_v47, %v812_v44 }
 0x1ce   : > { %861 = vst [vmem:[%s1575_s9 + $0x50] sm:$0xff] %v845_v3 }
 0x1cf   : > { %862 = vst [vmem:[%s1575_s9 + $0x58] sm:$0xff] %v846_v48 }
 0x1d1   : > { %v765_v42 = vpop.f32.mrf.mxu2 }
 0x1d2   : > { %v766_v52 = vadd.f32 %v765_v42, %v649_v50  ;;  %v814_v53 = vpop.f32.mrf.mxu3 }
 0x1d3   : > { %v815_v55 = vadd.f32 %v814_v53, %v649_v50 }
 0x1d4   : > { %v847_v7 = vadd.f32 %v831_v51, %v766_v52 }
 0x1d5   : > { %v848_v56 = vadd.f32 %v832_v54, %v815_v55 }
 0x1d6   : > { %863 = vst [vmem:[%s1575_s9 + $0x60] sm:$0xff] %v847_v7 }
 0x1d7   : > { %864 = vst [vmem:[%s1575_s9 + $0x68] sm:$0xff] %v848_v56 }
 0x1d9   : > { %v767_v60 = vpop.f32.mrf.mxu2 }
 0x1da   : > { %v768_v14 = vadd.f32 %v767_v60, %v654_v59  ;;  %v816_v62 = vpop.f32.mrf.mxu3 }
 0x1db   : > { %v817_v0 = vadd.f32 %v816_v62, %v654_v59 }
 0x1dc   : > { %v849_v4 = vadd.f32 %v833_v61, %v768_v14 }
 0x1dd   : > { %v850_v6 = vadd.f32 %v834_v63, %v817_v0 }
 0x1de   : > { %865 = vst [vmem:[%s1575_s9 + $0x70] sm:$0xff] %v849_v4 }
 0x1df   : > { %866 = vst [vmem:[%s1575_s9 + $0x78] sm:$0xff] %v850_v6 }
 0x1e0   : > { %1229 = shalt.err (!%p1226_p0)
}
 0x1e1   : > { %s1289_s29 = smov 256   ;;  %s1290_s9 = smov 16  }
 0x1e2   : > { %1104 = dma.vmem_to_hbm [thread:$0]  (%p1377_p9), %s883_s24, 2048, %s885_s30, %s868_s8, %s1289_s29, %s1289_s29, %s1290_s9  }
 0x1e3 PF: > { %s899_s14 = sand.u32 1, %s1264_s21   ;;  %p1111_p1 = pnand %p993_p12, %p1384_p11 }
 0x1e4   : > { %s900_s20 = scalar_lea.sflag [#allocation4], %s899_s14 }
 0x1e5   : > { %p1112_p2 = pneg %p1111_p1 }
 0x1e7   : > { %1259 = dma.done.wait (%p1112_p2), %s900_s20, 2048  }
 0x1e8   : > { %1261 = vsyncadd (%p1112_p2), %s900_s20, 4294965248  ;;  %s22_s26 = sadd.s32 1, %s1284_s26   ;;  %s1677_s10 = sld [smem:[#allocation8_spill]] }
 0x1e9   : > { %p19_p3 = scmp.ge.s32.totalorder %s22_s26, 4   ;;  %s1678_s21 = smov %s1268_s22 }
 0x1ea   : > { %s1679_s22 = smov %s1272_s23  ;;  %s1680_s23 = smov %s1382_s11 }
 0x1eb   : > { %s1681_s24 = smov %s1280_s25  ;;  %21 = sbr.rel (!%p19_p3) target bundleno = 6 (0x6), region = 92 }
 0x1ee   : > { %s1682_s25 = smov %s1677_s10 }
 0x1f0   :  { %906 = vsyncpa [#allocation3], 1 }
 0x1f1   :  { %908 = vsyncpa [#allocation3 + $0x1], 1 }
 0x1f2   :  { %909 = vsyncpa [#allocation4], 1 }
 0x1f3   :  { %911 = vsyncpa [#allocation4 + $0x1], 1 }

</bundles_post_ra>
